<compile_context>
chip_gen: v7x
topology: tpu7x:2x2x1
jax: 0.10.0
libtpu: 0.0.40
codegen_flags: <defaults>
</compile_context>

<pallas_src>
import functools

import jax
import jax.numpy as jnp
from jax import lax
from jax.experimental import pallas as pl
from jax.experimental.pallas import tpu as pltpu
from jax.scipy.special import digamma as ref_digamma

NPAD = 128  # lane padding so all vector work is lane-dense (max supported nintv)


def _digamma(x):
    """digamma for x > 0 (f32).

    sum_{k=0..5} 1/(x+k) == Q'(x)/Q(x) with Q(x) = x(x+1)...(x+5), evaluated with
    Horner (VALU), plus the asymptotic tail at x+6 reusing one reciprocal.
    Total: 2 divides + 1 log per element (was 7 divides + 1 log).
    """
    q = (((((x + 15.0) * x + 85.0) * x + 225.0) * x + 274.0) * x + 120.0) * x
    qp = ((((6.0 * x + 75.0) * x + 340.0) * x + 675.0) * x + 548.0) * x + 120.0
    x6 = x + 6.0
    inv = 1.0 / x6
    inv2 = inv * inv
    tail = inv * (0.5 + inv * (1.0 / 12.0 - inv2 * (1.0 / 120.0 - inv2 * (1.0 / 252.0))))
    return jnp.log(x6) - qp / q - tail


def _posterior_kernel(fp_ref, out_ref, *, nintv):
    fp = fp_ref[...]                     # (2, NPAD) f32
    logits = fp[0:1, :]                  # (1, NPAD)  p-logits
    wraw = fp[1:2, :]                    # (1, NPAD)  raw w

    eps = jnp.finfo(jnp.float32).eps
    lane = lax.broadcasted_iota(jnp.int32, (1, NPAD), 1)
    shift_mask = lane >= 1               # hoisted; reused by the d=1 scan step

    # p = clamp_probs(sigmoid(.)); then cat([p[:-1], 1]) -> last real lane forced to 1
    p = 1.0 / (1.0 + jnp.exp(-logits))
    p = jnp.clip(p, eps, 1.0 - eps)
    p = jnp.where(lane == nintv - 1, jnp.float32(1.0), p)

    # squareplus; cancellation-free branch for wraw < 0 (naive form underflows to 0
    # for large negative inputs, which would feed digamma a zero).
    sq = jnp.sqrt(wraw * wraw + 4.0)
    w = jnp.where(wraw > 0, 0.5 * (wraw + sq), 2.0 / (sq - wraw))

    # One batched digamma over a (3, NPAD) tile: rows = p*w, (1-p)*w, w.
    # Floors keep the forced p==1 lane (and any pathological underflow) finite; the
    # clamped value only ever reaches padding lanes (shift pushes it to lane nintv,
    # wrap-around at nintv==128 is masked by `lane >= 1`).
    pw = jnp.maximum(p * w, jnp.float32(1e-20))
    pmw = jnp.maximum((1.0 - p) * w, jnp.float32(1e-20))
    dig = _digamma(jnp.concatenate([pw, pmw, w], axis=0))    # (3, NPAD)
    gpw = dig[0:1, :]
    gpm_w = dig[1:2, :]
    gw = dig[2:3, :]

    # cumsum(cat([0, gpm_w[:-1]]) - gw) via a Hillis-Steele lane scan (XLU rolls).
    # Only ceil(log2(nintv)) steps are needed: lanes >= nintv are discarded upstream.
    shifted = jnp.where(shift_mask, pltpu.roll(gpm_w, 1, axis=1), jnp.float32(0.0))
    x = shifted - gw
    d = 1
    while d < nintv:
        mask = shift_mask if d == 1 else (lane >= d)
        x = x + jnp.where(mask, pltpu.roll(x, d, axis=1), jnp.float32(0.0))
        d *= 2
    elb = gpw + x

    # Single lane-dense packed store: rows 0=p, 1=w, 2=expected_logbeta.
    out_ref[...] = jnp.concatenate([p, w, elb], axis=0)


def _posterior_call(fp_pad, nintv):
    b = fp_pad.shape[0]
    return pl.pallas_call(
        functools.partial(_posterior_kernel, nintv=nintv),
        out_shape=jax.ShapeDtypeStruct((b, 3, NPAD), jnp.float32),
        grid=(b,),
        in_specs=[pl.BlockSpec((None, 2, NPAD), lambda i: (i, 0, 0))],
        out_specs=pl.BlockSpec((None, 3, NPAD), lambda i: (i, 0, 0)),
        compiler_params=pltpu.CompilerParams(dimension_semantics=("parallel",)),
    )(fp_pad)


@jax.jit
def posterior_inference_pallas_batched(free_params):
    """free_params: (B, nintv, 2) f32 -> (p, w, expected_logbeta), each (B, nintv)."""
    b, nintv, _ = free_params.shape
    if nintv > NPAD:
        # TODO(synk): support nintv > 128 via a lane-block grid carrying the running
        # prefix in SMEM (axis marked "arbitrary").
        raise ValueError(f"nintv={nintv} exceeds single-tile limit {NPAD}")
    # TODO(synk): the pad+transpose is one tiny fused XLA op; could be dropped if
    # callers keep free_params in (2, NPAD) layout upstream.
    fp_pad = jnp.zeros((b, 2, NPAD), jnp.float32).at[:, :, :nintv].set(
        jnp.swapaxes(free_params.astype(jnp.float32), 1, 2))
    out = _posterior_call(fp_pad, nintv)
    return out[:, 0, :nintv], out[:, 1, :nintv], out[:, 2, :nintv]


@jax.jit
def posterior_inference_pallas(free_params):
    """free_params: (nintv, 2) f32 -> (p, w, expected_logbeta), each (nintv,) f32."""
    p, w, elb = posterior_inference_pallas_batched(free_params[None])
    return p[0], w[0], elb[0]


def make_oracle_target(ground_truth):
    """OracleTarget: returns (ground_truth, 0.0, ground_truth repeated over batch)."""
    gt = jnp.asarray(ground_truth, jnp.float32)

    def target_fn(batch):
        batched = jnp.broadcast_to(gt[None, ...], (batch,) + gt.shape)
        return gt, jnp.float32(0.0), batched

    return target_fn


def make_synthetic_atoms(key, k, hdim):
    # TODO(synk): `atoms` is an externally injected nn.Module with no definition in
    # the source file; stubbed here as a deterministic plain-JAX callable.
    atom_base = jax.random.normal(key, (k, hdim), jnp.float32)

    def atoms_fn(mollify, batch):
        functional_samples = jnp.broadcast_to(atom_base, (batch, k, hdim)) * (1.0 - mollify)
        atom_kl = 0.5 * jnp.mean(atom_base ** 2)
        return functional_samples, atom_kl

    return atoms_fn


@functools.partial(jax.jit,
                   static_argnames=("atoms_fn", "target_fn", "batch", "deterministic"))
def oracle_intervention_dp_forward(free_params, alpha, atoms_fn, target_fn, batch,
                                   mollify=0.0, temperature=1.0, deterministic=False):
    # OracleInterventionDirichletProcess.forward:
    #   atoms -> posterior_inference (Pallas kernel) -> OracleTarget -> kl sum
    functional_samples, atom_kl = atoms_fn(mollify, batch)
    p, w, expected_logbeta = posterior_inference_pallas(free_params)
    intervention_kl = jnp.zeros((1,), jnp.float32)
    ipars = (p, w, alpha)
    target_probs, target_kl, target_samples = target_fn(batch)
    kl = intervention_kl + target_kl + atom_kl
    return target_samples, functional_samples, kl, ipars, expected_logbeta


def posterior_reference(free_params):
    """Pure-JAX reference mirroring the PyTorch math."""
    eps = jnp.finfo(jnp.float32).eps
    x = free_params.astype(jnp.float32)
    p = jnp.clip(jax.nn.sigmoid(x[:, 0]), eps, 1.0 - eps)
    p = jnp.concatenate([p[:-1], jnp.ones((1,), jnp.float32)])
    w = 0.5 * (x[:, 1] + jnp.sqrt(x[:, 1] ** 2 + 4.0))
    gpw = ref_digamma(p * w)
    gpm = ref_digamma((1.0 - p) * w)
    gw = ref_digamma(w)
    cum = jnp.cumsum(jnp.concatenate([jnp.zeros((1,), jnp.float32), gpm[:-1]]) - gw)
    return p, w, gpw + cum


if __name__ == "__main__":
    key = jax.random.PRNGKey(0)
    k_fp, k_gt, k_atom, k_b, k_1, k_128 = jax.random.split(key, 6)

    batch, nintv, k, hdim = 2, 8, 8, 32
    free_params = jax.random.normal(k_fp, (nintv, 2), jnp.float32)  # ~ torch.randn(nintv, 2)
    alpha = jnp.ones((1,), jnp.float32)                             # alpha=None branch
    ground_truth = (jax.random.uniform(k_gt, (k, nintv)) > 0.5).astype(jnp.float32)

    target_fn = make_oracle_target(ground_truth)
    atoms_fn = make_synthetic_atoms(k_atom, k, hdim)

    outs = oracle_intervention_dp_forward(
        free_params, alpha, atoms_fn, target_fn, batch=batch)
    target_samples, functional_samples, kl, ipars, expected_logbeta = (
        jax.block_until_ready(outs))
    p, w, alpha_out = ipars

    p_r, w_r, elb_r = posterior_reference(free_params)
    assert bool(jnp.allclose(p, p_r, atol=1e-5, rtol=1e-5))
    assert bool(jnp.allclose(w, w_r, atol=1e-5, rtol=1e-5))
    assert bool(jnp.allclose(expected_logbeta, elb_r, atol=1e-3, rtol=5e-4))
    assert target_samples.shape == (batch, k, nintv)
    assert functional_samples.shape == (batch, k, hdim)
    assert kl.shape == (1,)

    # Edge cases flagged in review: nintv=1 and nintv=128 (full tile, wrap-around).
    for kk, nn in ((k_1, 1), (k_128, 128)):
        fp_e = jax.random.normal(kk, (nn, 2), jnp.float32)
        pe, we, ee = jax.block_until_ready(posterior_inference_pallas(fp_e))
        pr, wr, er = posterior_reference(fp_e)
        assert bool(jnp.allclose(pe, pr, atol=1e-5, rtol=1e-5)), nn
        assert bool(jnp.allclose(we, wr, atol=1e-5, rtol=1e-5)), nn
        assert bool(jnp.allclose(ee, er, atol=1e-3, rtol=5e-4)), nn

    # Batched-instance path: grid=(B,), parallel axis (sharded across v7x's 2 TCs).
    fp_b = jax.random.normal(k_b, (3, nintv, 2), jnp.float32)
    pb, wb, eb = jax.block_until_ready(posterior_inference_pallas_batched(fp_b))
    for bi in range(3):
        pr, wr, er = posterior_reference(fp_b[bi])
        assert bool(jnp.allclose(pb[bi], pr, atol=1e-5, rtol=1e-5))
        assert bool(jnp.allclose(wb[bi], wr, atol=1e-5, rtol=1e-5))
        assert bool(jnp.allclose(eb[bi], er, atol=1e-3, rtol=5e-4))

    print("KERNEL_OK")
</pallas_src>

<mosaic_0001>
module attributes {stable_mosaic.version = 11 : i64} {
  func.func @_posterior_kernel(%arg0: i32, %arg1: memref<1x2x128xf32, #tpu.memory_space<vmem>>, %arg2: memref<1x3x128xf32, #tpu.memory_space<vmem>>) attributes {dimension_semantics = [#tpu.dimension_semantics<parallel>], iteration_bounds = array<i64: 1>, scalar_prefetch = 0 : i64, scratch_operands = 0 : i64, tpu.core_type = #tpu.core_type<tc>, window_params = [{transform_indices = @transform_0, window_bounds = array<i64: 1, 2, 128>}, {transform_indices = @transform_1, window_bounds = array<i64: 1, 3, 128>}]} {
    %c0 = arith.constant 0 : index
    %c0_0 = arith.constant 0 : index
    %c0_1 = arith.constant 0 : index
    %0 = vector.load %arg1[%c0, %c0_0, %c0_1] : memref<1x2x128xf32, #tpu.memory_space<vmem>>, vector<1x2x128xf32>
    %1 = vector.shape_cast %0 : vector<1x2x128xf32> to vector<2x128xf32>
    %2 = vector.extract_strided_slice %1 {offsets = [0, 0], sizes = [1, 128], strides = [1, 1]} : vector<2x128xf32> to vector<1x128xf32>
    %3 = vector.extract_strided_slice %1 {offsets = [1, 0], sizes = [1, 128], strides = [1, 1]} : vector<2x128xf32> to vector<1x128xf32>
    %4 = tpu.iota {dimensions = array<i32: 1>} : vector<1x128xi32>
    %c1_i32 = arith.constant 1 : i32
    %5 = vector.broadcast %c1_i32 : i32 to vector<1x128xi32>
    %6 = arith.cmpi sge, %4, %5 : vector<1x128xi32>
    %cst = arith.constant 0.000000e+00 : f32
    %7 = vector.broadcast %cst : f32 to vector<1x128xf32>
    %8 = arith.subf %7, %2 : vector<1x128xf32>
    %9 = math.exp %8 : vector<1x128xf32>
    %cst_2 = arith.constant 1.000000e+00 : f32
    %10 = vector.broadcast %cst_2 : f32 to vector<1x128xf32>
    %11 = arith.addf %10, %9 : vector<1x128xf32>
    %cst_3 = arith.constant 1.000000e+00 : f32
    %12 = vector.broadcast %cst_3 : f32 to vector<1x128xf32>
    %13 = arith.divf %12, %11 : vector<1x128xf32>
    %cst_4 = arith.constant 1.1920929E-7 : f32
    %cst_5 = arith.constant 0.99999988 : f32
    %14 = vector.broadcast %cst_4 : f32 to vector<1x128xf32>
    %15 = arith.maximumf %14, %13 : vector<1x128xf32>
    %16 = vector.broadcast %cst_5 : f32 to vector<1x128xf32>
    %17 = arith.minimumf %16, %15 : vector<1x128xf32>
    %c7_i32 = arith.constant 7 : i32
    %18 = vector.broadcast %c7_i32 : i32 to vector<1x128xi32>
    %19 = arith.cmpi eq, %4, %18 : vector<1x128xi32>
    %cst_6 = arith.constant 1.000000e+00 : f32
    %20 = vector.broadcast %cst_6 : f32 to vector<1x128xf32>
    %21 = arith.select %19, %20, %17 : vector<1x128xi1>, vector<1x128xf32>
    %22 = arith.mulf %3, %3 : vector<1x128xf32>
    %cst_7 = arith.constant 4.000000e+00 : f32
    %23 = vector.broadcast %cst_7 : f32 to vector<1x128xf32>
    %24 = arith.addf %22, %23 : vector<1x128xf32>
    %25 = math.sqrt %24 : vector<1x128xf32>
    %cst_8 = arith.constant 0.000000e+00 : f32
    %26 = vector.broadcast %cst_8 : f32 to vector<1x128xf32>
    %27 = arith.cmpf ogt, %3, %26 : vector<1x128xf32>
    %28 = arith.addf %3, %25 : vector<1x128xf32>
    %cst_9 = arith.constant 5.000000e-01 : f32
    %29 = vector.broadcast %cst_9 : f32 to vector<1x128xf32>
    %30 = arith.mulf %29, %28 : vector<1x128xf32>
    %31 = arith.subf %25, %3 : vector<1x128xf32>
    %cst_10 = arith.constant 2.000000e+00 : f32
    %32 = vector.broadcast %cst_10 : f32 to vector<1x128xf32>
    %33 = arith.divf %32, %31 : vector<1x128xf32>
    %34 = arith.select %27, %30, %33 : vector<1x128xi1>, vector<1x128xf32>
    %35 = arith.mulf %21, %34 : vector<1x128xf32>
    %cst_11 = arith.constant 9.99999968E-21 : f32
    %36 = vector.broadcast %cst_11 : f32 to vector<1x128xf32>
    %37 = arith.maximumf %35, %36 : vector<1x128xf32>
    %cst_12 = arith.constant 1.000000e+00 : f32
    %38 = vector.broadcast %cst_12 : f32 to vector<1x128xf32>
    %39 = arith.subf %38, %21 : vector<1x128xf32>
    %40 = arith.mulf %39, %34 : vector<1x128xf32>
    %cst_13 = arith.constant 9.99999968E-21 : f32
    %41 = vector.broadcast %cst_13 : f32 to vector<1x128xf32>
    %42 = arith.maximumf %40, %41 : vector<1x128xf32>
    %43 = tpu.concatenate %37, %42, %34 in 0 : vector<1x128xf32>, vector<1x128xf32>, vector<1x128xf32> -> vector<3x128xf32>
    %cst_14 = arith.constant 1.500000e+01 : f32
    %44 = vector.broadcast %cst_14 : f32 to vector<3x128xf32>
    %45 = arith.addf %43, %44 : vector<3x128xf32>
    %46 = arith.mulf %45, %43 : vector<3x128xf32>
    %cst_15 = arith.constant 8.500000e+01 : f32
    %47 = vector.broadcast %cst_15 : f32 to vector<3x128xf32>
    %48 = arith.addf %46, %47 : vector<3x128xf32>
    %49 = arith.mulf %48, %43 : vector<3x128xf32>
    %cst_16 = arith.constant 2.250000e+02 : f32
    %50 = vector.broadcast %cst_16 : f32 to vector<3x128xf32>
    %51 = arith.addf %49, %50 : vector<3x128xf32>
    %52 = arith.mulf %51, %43 : vector<3x128xf32>
    %cst_17 = arith.constant 2.740000e+02 : f32
    %53 = vector.broadcast %cst_17 : f32 to vector<3x128xf32>
    %54 = arith.addf %52, %53 : vector<3x128xf32>
    %55 = arith.mulf %54, %43 : vector<3x128xf32>
    %cst_18 = arith.constant 1.200000e+02 : f32
    %56 = vector.broadcast %cst_18 : f32 to vector<3x128xf32>
    %57 = arith.addf %55, %56 : vector<3x128xf32>
    %58 = arith.mulf %57, %43 : vector<3x128xf32>
    %cst_19 = arith.constant 6.000000e+00 : f32
    %59 = vector.broadcast %cst_19 : f32 to vector<3x128xf32>
    %60 = arith.mulf %59, %43 : vector<3x128xf32>
    %cst_20 = arith.constant 7.500000e+01 : f32
    %61 = vector.broadcast %cst_20 : f32 to vector<3x128xf32>
    %62 = arith.addf %60, %61 : vector<3x128xf32>
    %63 = arith.mulf %62, %43 : vector<3x128xf32>
    %cst_21 = arith.constant 3.400000e+02 : f32
    %64 = vector.broadcast %cst_21 : f32 to vector<3x128xf32>
    %65 = arith.addf %63, %64 : vector<3x128xf32>
    %66 = arith.mulf %65, %43 : vector<3x128xf32>
    %cst_22 = arith.constant 6.750000e+02 : f32
    %67 = vector.broadcast %cst_22 : f32 to vector<3x128xf32>
    %68 = arith.addf %66, %67 : vector<3x128xf32>
    %69 = arith.mulf %68, %43 : vector<3x128xf32>
    %cst_23 = arith.constant 5.480000e+02 : f32
    %70 = vector.broadcast %cst_23 : f32 to vector<3x128xf32>
    %71 = arith.addf %69, %70 : vector<3x128xf32>
    %72 = arith.mulf %71, %43 : vector<3x128xf32>
    %cst_24 = arith.constant 1.200000e+02 : f32
    %73 = vector.broadcast %cst_24 : f32 to vector<3x128xf32>
    %74 = arith.addf %72, %73 : vector<3x128xf32>
    %cst_25 = arith.constant 6.000000e+00 : f32
    %75 = vector.broadcast %cst_25 : f32 to vector<3x128xf32>
    %76 = arith.addf %43, %75 : vector<3x128xf32>
    %cst_26 = arith.constant 1.000000e+00 : f32
    %77 = vector.broadcast %cst_26 : f32 to vector<3x128xf32>
    %78 = arith.divf %77, %76 : vector<3x128xf32>
    %79 = arith.mulf %78, %78 : vector<3x128xf32>
    %cst_27 = arith.constant 0.0039682542 : f32
    %80 = vector.broadcast %cst_27 : f32 to vector<3x128xf32>
    %81 = arith.mulf %79, %80 : vector<3x128xf32>
    %cst_28 = arith.constant 0.00833333377 : f32
    %82 = vector.broadcast %cst_28 : f32 to vector<3x128xf32>
    %83 = arith.subf %82, %81 : vector<3x128xf32>
    %84 = arith.mulf %79, %83 : vector<3x128xf32>
    %cst_29 = arith.constant 0.0833333358 : f32
    %85 = vector.broadcast %cst_29 : f32 to vector<3x128xf32>
    %86 = arith.subf %85, %84 : vector<3x128xf32>
    %87 = arith.mulf %78, %86 : vector<3x128xf32>
    %cst_30 = arith.constant 5.000000e-01 : f32
    %88 = vector.broadcast %cst_30 : f32 to vector<3x128xf32>
    %89 = arith.addf %88, %87 : vector<3x128xf32>
    %90 = arith.mulf %78, %89 : vector<3x128xf32>
    %91 = math.log %76 : vector<3x128xf32>
    %92 = arith.divf %74, %58 : vector<3x128xf32>
    %93 = arith.subf %91, %92 : vector<3x128xf32>
    %94 = arith.subf %93, %90 : vector<3x128xf32>
    %95 = vector.extract_strided_slice %94 {offsets = [0, 0], sizes = [1, 128], strides = [1, 1]} : vector<3x128xf32> to vector<1x128xf32>
    %96 = vector.extract_strided_slice %94 {offsets = [1, 0], sizes = [1, 128], strides = [1, 1]} : vector<3x128xf32> to vector<1x128xf32>
    %97 = vector.extract_strided_slice %94 {offsets = [2, 0], sizes = [1, 128], strides = [1, 1]} : vector<3x128xf32> to vector<1x128xf32>
    %c1_i32_31 = arith.constant 1 : i32
    %98 = tpu.dynamic_rotate %96 by %c1_i32_31 dim 1 : vector<1x128xf32>, i32 -> vector<1x128xf32>
    %cst_32 = arith.constant 0.000000e+00 : f32
    %99 = vector.broadcast %cst_32 : f32 to vector<1x128xf32>
    %100 = arith.select %6, %98, %99 : vector<1x128xi1>, vector<1x128xf32>
    %101 = arith.subf %100, %97 : vector<1x128xf32>
    %c1_i32_33 = arith.constant 1 : i32
    %102 = tpu.dynamic_rotate %101 by %c1_i32_33 dim 1 : vector<1x128xf32>, i32 -> vector<1x128xf32>
    %cst_34 = arith.constant 0.000000e+00 : f32
    %103 = vector.broadcast %cst_34 : f32 to vector<1x128xf32>
    %104 = arith.select %6, %102, %103 : vector<1x128xi1>, vector<1x128xf32>
    %105 = arith.addf %101, %104 : vector<1x128xf32>
    %c2_i32 = arith.constant 2 : i32
    %106 = vector.broadcast %c2_i32 : i32 to vector<1x128xi32>
    %107 = arith.cmpi sge, %4, %106 : vector<1x128xi32>
    %c2_i32_35 = arith.constant 2 : i32
    %108 = tpu.dynamic_rotate %105 by %c2_i32_35 dim 1 : vector<1x128xf32>, i32 -> vector<1x128xf32>
    %cst_36 = arith.constant 0.000000e+00 : f32
    %109 = vector.broadcast %cst_36 : f32 to vector<1x128xf32>
    %110 = arith.select %107, %108, %109 : vector<1x128xi1>, vector<1x128xf32>
    %111 = arith.addf %105, %110 : vector<1x128xf32>
    %c4_i32 = arith.constant 4 : i32
    %112 = vector.broadcast %c4_i32 : i32 to vector<1x128xi32>
    %113 = arith.cmpi sge, %4, %112 : vector<1x128xi32>
    %c4_i32_37 = arith.constant 4 : i32
    %114 = tpu.dynamic_rotate %111 by %c4_i32_37 dim 1 : vector<1x128xf32>, i32 -> vector<1x128xf32>
    %cst_38 = arith.constant 0.000000e+00 : f32
    %115 = vector.broadcast %cst_38 : f32 to vector<1x128xf32>
    %116 = arith.select %113, %114, %115 : vector<1x128xi1>, vector<1x128xf32>
    %117 = arith.addf %111, %116 : vector<1x128xf32>
    %118 = arith.addf %95, %117 : vector<1x128xf32>
    %119 = tpu.concatenate %21, %34, %118 in 0 : vector<1x128xf32>, vector<1x128xf32>, vector<1x128xf32> -> vector<3x128xf32>
    %c0_39 = arith.constant 0 : index
    %c0_40 = arith.constant 0 : index
    %c0_41 = arith.constant 0 : index
    %120 = vector.load %arg2[%c0_39, %c0_40, %c0_41] : memref<1x3x128xf32, #tpu.memory_space<vmem>>, vector<1x3x128xf32>
    %121 = vector.shape_cast %120 : vector<1x3x128xf32> to vector<3x128xf32>
    %122 = vector.shape_cast %119 : vector<3x128xf32> to vector<1x3x128xf32>
    tpu.vector_store %arg2[%c0_39, %c0_40, %c0_41], %122 {strides = array<i32>} : memref<1x3x128xf32, #tpu.memory_space<vmem>>, vector<1x3x128xf32>,
    return
  }
  func.func @transform_0(%arg0: i32) -> (i32, i32, i32) {
    %c0_i32 = arith.constant 0 : i32
    %c0_i32_0 = arith.constant 0 : i32
    %c0_i32_1 = arith.constant 0 : i32
    return %arg0, %c0_i32, %c0_i32_0 : i32, i32, i32
  }
  func.func @transform_1(%arg0: i32) -> (i32, i32, i32) {
    %c0_i32 = arith.constant 0 : i32
    %c0_i32_0 = arith.constant 0 : i32
    %c0_i32_1 = arith.constant 0 : i32
    return %arg0, %c0_i32, %c0_i32_0 : i32, i32, i32
  }
}

</mosaic_0001>

<bundles_post_ra>
// kernel: posterior_inference_pallas_batched.1
= control target key start
LH: loop header
LB: loop body
LE: loop exit
PB: predicated region body
PF: predicated region fallthrough
CT: control target
= control target key end

     0   :  { %v9_v13 = vlaneseq  ;;  %vm51_vm4 = vcmask 1040384   ;;  %vm53_vm5 = vcmask 1041408   ;;  %s144_s8 = smov 2   ;;  %s145_s9 = smov 4   ;;  %s182_s0 = inlined_call_operand.vmem [shape: f32[1,2,128], index: 0, kind: input, shape index: {}]   ;;  %s183_s1 = inlined_call_operand.vmem [shape: f32[1,3,128], index: 1, kind: output, shape index: {}]  }
   0x1   :  { %v8_v0 = vld [vmem:[%s182_s0] sm:$0x3]  ;;  %s143_s0 = smov 1  }
   0x2   :  { %v12_v1 = vsub.f32 0.0, %v8_v0  ;;  %v22_v2 = vmul.f32 %v8_v0, %v8_v0  ;;  %v159_v14 = vand.u32 127, %v9_v13  ;;  %vm31_vm3 = vcmp.gt.f32.partialorder %v8_v0, 0.0 }
   0x4   :  { %v13_v3 = vmul.f32 1.442695, %v12_v1  ;;  %v23_v4 = vadd.f32 4.0, %v22_v2  ;;  %vm20_vm2 = vcmp.eq.s32.totalorder %v159_v14, 7  ;;  %vm11_vm6 = vcmp.ge.s32.totalorder %v159_v14, 1 }
   0x5   :  { %vm105_vm7 = vcmp.ge.s32.totalorder %v159_v14, 2  ;;  %vm110_vm8 = vcmp.ge.s32.totalorder %v159_v14, 4 }
   0x6   :  { %129 = vpow2.f32 %v13_v3  ;;  %vm26_vm0 = vcmp.eq.f32.partialorder %v23_v4, inf  ;;  %v29_v8 = vand.u32 2147483648, %v23_v4  ;;  %vm28_vm1 = vcmp.eq.f32.partialorder %v23_v4, 0.0 }
   0x7   :  { %131 = vrsqrt.f32 %v23_v4 }
  0x10   :  { %v130_v5 = vpop.eup %129 }
  0x11   :  { %v132_v6 = vpop.eup %131  ;;  %v15_v7 = vadd.f32 1.0, %v130_v5 }
  0x12   :  { %v25_v9 = vmul.f32 %v132_v6, %v23_v4 }
  0x13   :  { %133 = vrcp.f32 %v15_v7 }
  0x14   :  { %v27_v10 = vsel %vm26_vm0, %v23_v4, %v25_v9 }
  0x15   :  { %v30_v11 = vsel %vm28_vm1, %v29_v8, %v27_v10 }
  0x16   :  { %v34_v12 = vsub.f32 %v30_v11, %v8_v0  ;;  %v32_v16 = vadd.f32 %v30_v11, %v8_v0 }
  0x18   :  { %135 = vrcp.f32 %v34_v12  ;;  %v33_v19 = vmul.f32 0.5, %v32_v16 }
  0x1d   :  { %v134_v15 = vpop.eup %133 }
  0x1e   :  { %v18_v17 = vmax.f32 %v134_v15, 1.1920929e-07 }
  0x20   :  { %v19_v18 = vmin.f32 %v18_v17, 0.9999999 }
  0x22   :  { %v136_v20 = vpop.eup %135  ;;  %v162_v21 = vsel %vm20_vm2, 1.0, %v19_v18 }
  0x23   :  { %v36_v22 = vmul.f32 2.0, %v136_v20  ;;  %v43_v23 = vsub.f32 1.0, %v162_v21 }
  0x25   :  { %v165_v24 = vsel %vm31_vm3, %v33_v19, %v36_v22 }
  0x26   :  { %v39_v25 = vrot.slane %v165_v24, 1  ;;  %v49_v30 = vrot.slane %v165_v24, 7 }
  0x28   :  { %v41_v26 = vmul.f32 %v39_v25, %v162_v21  ;;  %v44_v27 = vmul.f32 %v43_v23, %v39_v25  ;;  %v119_v23 = vsel %vm51_vm4, %v162_v21, %v165_v24 }
  0x2a   :  { %v42_v28 = vmax.f32 %v41_v26, 1e-20  ;;  %v45_v29 = vmax.f32 %v44_v27, 1e-20 }
  0x2c   :  { %v47_v31 = vrot.slane %v45_v29, 7 }
  0x2e   :  { %v52_v32 = vsel %vm51_vm4, %v42_v28, %v47_v31 }
  0x2f   :  { %v54_v33 = vsel %vm53_vm5, %v52_v32, %v49_v30 }
  0x30   :  { %v55_v34 = vadd.f32 15.0, %v54_v33  ;;  %v65_v35 = vmul.f32 6.0, %v54_v33  ;;  %v75_v36 = vadd.f32 6.0, %v54_v33 }
  0x32   :  { %v56_v37 = vmul.f32 %v55_v34, %v54_v33  ;;  %v66_v38 = vadd.f32 75.0, %v65_v35  ;;  %137 = vrcp.f32 %v75_v36 }
  0x33   :  { %139 = vlog2.f32 %v75_v36 }
  0x34   :  { %v57_v39 = vadd.f32 85.0, %v56_v37  ;;  %v67_v40 = vmul.f32 %v66_v38, %v54_v33 }
  0x36   :  { %v58_v41 = vmul.f32 %v57_v39, %v54_v33  ;;  %v68_v42 = vadd.f32 340.0, %v67_v40 }
  0x38   :  { %v59_v43 = vadd.f32 225.0, %v58_v41  ;;  %v69_v44 = vmul.f32 %v68_v42, %v54_v33 }
  0x3a   :  { %v60_v45 = vmul.f32 %v59_v43, %v54_v33  ;;  %v70_v46 = vadd.f32 675.0, %v69_v44 }
  0x3c   :  { %v138_v47 = vpop.eup %137  ;;  %v61_v48 = vadd.f32 274.0, %v60_v45  ;;  %v71_v51 = vmul.f32 %v70_v46, %v54_v33 }
  0x3d   :  { %v78_v49 = vmul.f32 %v138_v47, %v138_v47  ;;  %v140_v61 = vpop.eup %139 }
  0x3e   :  { %v62_v50 = vmul.f32 %v61_v48, %v54_v33  ;;  %v72_v56 = vadd.f32 548.0, %v71_v51  ;;  %v87_v0 = vmul.f32 0.6931472, %v140_v61 }
  0x3f   :  { %v79_v52 = vmul.f32 0.003968254, %v78_v49 }
  0x40   :  { %v63_v53 = vadd.f32 120.0, %v62_v50  ;;  %v73_v59 = vmul.f32 %v72_v56, %v54_v33 }
  0x41   :  { %v80_v54 = vsub.f32 0.008333334, %v79_v52 }
  0x42   :  { %v64_v55 = vmul.f32 %v63_v53, %v54_v33  ;;  %v74_v62 = vadd.f32 120.0, %v73_v59 }
  0x43   :  { %v81_v57 = vmul.f32 %v80_v54, %v78_v49 }
  0x44   :  { %141 = vrcp.f32 %v64_v55 }
  0x45   :  { %v82_v58 = vsub.f32 0.083333336, %v81_v57 }
  0x47   :  { %v83_v60 = vmul.f32 %v138_v47, %v82_v58 }
  0x49   :  { %v84_v63 = vadd.f32 0.5, %v83_v60 }
  0x4b   :  { %v85_v2 = vmul.f32 %v138_v47, %v84_v63 }
  0x4e   :  { %v142_v1 = vpop.eup %141 }
  0x4f   :  { %v89_v3 = vmul.f32 %v142_v1, %v74_v62 }
  0x51   :  { %v90_v4 = vsub.f32 %v87_v0, %v89_v3 }
  0x53   :  { %v91_v5 = vsub.f32 %v90_v4, %v85_v2 }
  0x55   :  { %v93_v6 = vrot.slane %v91_v5, 1  ;;  %v98_v7 = vrot.slane %v91_v5, 2 }
  0x57   :  { %95 = vrot.lane.b32.xlu0 %v93_v6, %s143_s0 }
  0xc9   :  { %v96_v8 = vpop.permute.xlu0 %95 }
  0xca   :  { %v97_v9 = vsel %vm11_vm6, %v96_v8, 0.0 }
  0xcb   :  { %v100_v10 = vsub.f32 %v97_v9, %v98_v7 }
  0xcd   :  { %101 = vrot.lane.b32.xlu0 %v100_v10, %s143_s0 }
 0x13f   :  { %v102_v11 = vpop.permute.xlu0 %101 }
 0x140   :  { %v103_v12 = vsel %vm11_vm6, %v102_v11, 0.0 }
 0x141   :  { %v104_v13 = vadd.f32 %v103_v12, %v100_v10 }
 0x143   :  { %106 = vrot.lane.b32.xlu1 %v104_v13, %s144_s8 }
 0x1b5   :  { %v107_v15 = vpop.permute.xlu1 %106 }
 0x1b6   :  { %v108_v16 = vsel %vm105_vm7, %v107_v15, 0.0 }
 0x1b7   :  { %v109_v17 = vadd.f32 %v108_v16, %v104_v13 }
 0x1b9   :  { %111 = vrot.lane.b32.xlu1 %v109_v17, %s145_s9 }
 0x22b   :  { %v112_v18 = vpop.permute.xlu1 %111 }
 0x22c   :  { %v113_v19 = vsel %vm110_vm8, %v112_v18, 0.0 }
 0x22d   :  { %v114_v20 = vadd.f32 %v113_v19, %v109_v17 }
 0x22f   :  { %v115_v22 = vadd.f32 %v114_v20, %v91_v5 }
 0x231   :  { %v117_v25 = vrot.slane %v115_v22, 6 }
 0x233   :  { %v120_v26 = vsel %vm53_vm5, %v119_v23, %v117_v25 }
 0x234   :  { %121 = vst [vmem:[%s183_s1] sm:$0x7] %v120_v26 }

</bundles_post_ra>
